<compile_context>
chip_gen: v7x
topology: tpu7x:2x2x1
jax: 0.10.0
libtpu: 0.0.40
codegen_flags: <defaults>
</compile_context>

<pallas_src>
import functools

import jax
import jax.numpy as jnp
from jax.experimental import pallas as pl
from jax.experimental.pallas import tpu as pltpu


def _round_up(x, m):
    return (x + m - 1) // m * m


# ------------------------------ Pallas kernel ---------------------------------

def _att_comp_kernel(x_ref, wqkv_ref, bqkv_ref, wv2t_ref, bv2t_ref, skinny_ref,
                     wt2v_ref, bt2v_ref, wv2w_ref, bv2w_ref, out_ref,
                     *, inv_sqrtdk, d_key, d_value, n_topic, lane_pad):
    Bt, n, d_word = x_ref.shape
    rows = Bt * n

    x2d = x_ref[...].reshape(rows, d_word)                      # bf16 (rows, d_word)

    # Fused Q|K|V projection (bf16 operands, f32 accumulation on the MXU).
    qkv = jnp.dot(x2d, wqkv_ref[...],
                  preferred_element_type=jnp.float32) + bqkv_ref[...]
    q = qkv[:, :d_key].reshape(Bt, n, d_key)
    k = qkv[:, d_key:2 * d_key].reshape(Bt, n, d_key)
    v = qkv[:, 2 * d_key:].reshape(Bt, n, d_value)

    # Scaled dot-product attention scores; softmax kept in f32.
    scaled = jnp.einsum('bqd,bkd->bqk',
                        q.astype(jnp.bfloat16), k.astype(jnp.bfloat16),
                        preferred_element_type=jnp.float32) * inv_sqrtdk
    m = jnp.max(scaled, axis=-1, keepdims=True)
    e = jnp.exp(scaled - m)
    rowsum = jnp.sum(e, axis=-1, keepdims=True)
    att_weight = e * pl.reciprocal(rowsum, approx=True)          # (Bt, n, n)

    word_repre = jnp.einsum('bqk,bkd->bqd',
                            att_weight.astype(jnp.bfloat16),
                            v.astype(jnp.bfloat16),
                            preferred_element_type=jnp.float32)  # (Bt, n, d_value)

    # "No-self" attention, reusing e / rowsum of the first softmax:
    #   word_repre_ns[i] = (rowsum[i]*word_repre[i] - e[i,i]*v[i]) / (rowsum[i]-e[i,i])
    ridx = jax.lax.broadcasted_iota(jnp.int32, (Bt, n, n), 1)
    cidx = jax.lax.broadcasted_iota(jnp.int32, (Bt, n, n), 2)
    diag_e = jnp.sum(jnp.where(ridx == cidx, e, 0.0), axis=-1, keepdims=True)
    word_repre_ns = ((rowsum * word_repre - diag_e * v)
                     * pl.reciprocal(rowsum - diag_e, approx=True))

    # V2T + softmax over topics (per token).
    wr2d = word_repre.reshape(rows, d_value)
    topic_score = jnp.dot(wr2d.astype(jnp.bfloat16), wv2t_ref[...],
                          preferred_element_type=jnp.float32) + bv2t_ref[...]
    tsm = jnp.max(topic_score, axis=-1, keepdims=True)
    tse = jnp.exp(topic_score - tsm)
    topic_weight2d = tse * pl.reciprocal(jnp.sum(tse, axis=-1, keepdims=True),
                                         approx=True)            # (rows, n_topic)
    topic_weight = topic_weight2d.reshape(Bt, n, n_topic)

    # Sentence topic distribution: softmax_t( sum_i tw[b,i,t] * w_t2l[i] ).
    # (T2L's scalar bias shifts every logit equally -> cancels in the softmax.)
    wt2l = skinny_ref[:, 0:1]                                     # (n, 1)
    wl2t = skinny_ref[:, 1:2]                                     # (n, 1)
    bl2t = skinny_ref[:, 2:3]                                     # (n, 1)
    tl = jnp.sum(topic_weight * wt2l[None, :, :], axis=1)         # (Bt, n_topic)
    tlm = jnp.max(tl, axis=-1, keepdims=True)
    tle = jnp.exp(tl - tlm)
    topic = tle * pl.reciprocal(jnp.sum(tle, axis=-1, keepdims=True), approx=True)

    # topic_recon = L2T(topic).transpose(2,1) ; value_recon = T2V(topic_recon)
    topic_recon = wl2t[None, :, :] * topic[:, None, :] + bl2t[None, :, :]
    value_recon = jnp.dot(topic_recon.reshape(rows, n_topic).astype(jnp.bfloat16),
                          wt2v_ref[...],
                          preferred_element_type=jnp.float32) + bt2v_ref[...]

    # word_recon_no_self = V2W(word_repre_no_self)
    word_recon_ns = jnp.dot(word_repre_ns.reshape(rows, d_value).astype(jnp.bfloat16),
                            wv2w_ref[...],
                            preferred_element_type=jnp.float32) + bv2w_ref[...]
    # NOTE: self.word_recon (V2W(word_repre)) is computed by the torch module but
    # never used in any returned loss, so it is omitted here.

    # One lane-dense packed store (last dim padded to a multiple of 128 lanes).
    pieces = [att_weight.reshape(rows, n), wr2d, topic_weight2d,
              value_recon, word_recon_ns]
    if lane_pad:
        pieces.append(jnp.zeros((rows, lane_pad), jnp.float32))
    packed = jnp.concatenate(pieces, axis=-1)
    out_ref[...] = packed.reshape(Bt, n, packed.shape[-1])


def att_comp_pallas(x_emb, p, *, max_block_batch=16):
    """Runs the attention/projection hot path. Returns the unpacked tensors."""
    B, n, d_word = x_emb.shape
    d_key = p["wq"].shape[1]
    d_value = p["wv"].shape[1]
    n_topic = p["wv2t"].shape[1]

    # Largest divisor of B not exceeding max_block_batch -> batch-chunk size.
    bt = 1
    for c in range(1, min(B, max_block_batch) + 1):
        if B % c == 0:
            bt = c
    grid = (B // bt,)

    # Fused / pre-cast weights (bf16 matmul operands, f32 biases).
    wqkv = jnp.concatenate([p["wq"], p["wk"], p["wv"]], axis=1).astype(jnp.bfloat16)
    bqkv = jnp.concatenate([p["bq"], p["bk"], p["bv"]], axis=1)
    wv2t = p["wv2t"].astype(jnp.bfloat16)
    wt2v = p["wt2v"].astype(jnp.bfloat16)
    wv2w = p["wv2w"].astype(jnp.bfloat16)
    skinny = jnp.concatenate([p["wt2l"], p["wl2t"], p["bl2t"]], axis=1)  # (n, 3) f32
    weights = [wqkv, bqkv, wv2t, p["bv2t"], skinny, wt2v, p["bt2v"], wv2w, p["bv2w"]]

    x_bf = x_emb.astype(jnp.bfloat16)

    cat = n + d_value + n_topic + d_value + d_word
    P = max(128, _round_up(cat, 128))
    lane_pad = P - cat

    def full(arr):
        nd = arr.ndim
        return pl.BlockSpec(arr.shape, lambda b, _nd=nd: (0,) * _nd)

    in_specs = ([pl.BlockSpec((bt, n, d_word), lambda b: (b, 0, 0))]
                + [full(w) for w in weights])
    out_specs = pl.BlockSpec((bt, n, P), lambda b: (b, 0, 0))
    out_shape = jax.ShapeDtypeStruct((B, n, P), jnp.float32)

    # Advisory cost estimate for the surrounding XLA schedule.
    flops = 2 * B * n * (d_word * (2 * d_key + d_value)   # fused QKV
                         + n * d_key + n * d_value        # scores + att@V
                         + d_value * n_topic              # V2T
                         + n_topic * d_value              # T2V
                         + d_value * d_word)              # V2W
    transcendentals = B * (n * n + n * n_topic + n_topic)
    w_bytes = sum(int(w.size) * w.dtype.itemsize for w in weights)
    bytes_accessed = int(x_bf.size) * 2 + w_bytes + B * n * P * 4
    cost = pl.CostEstimate(flops=int(flops), transcendentals=int(transcendentals),
                           bytes_accessed=int(bytes_accessed))

    # Explicit VMEM budget (double-buffered x + out blocks, weights, headroom).
    blk_bytes = 2 * (bt * n * d_word * 2 + bt * n * P * 4)
    vmem_limit = min(64 * 1024 * 1024,
                     max(32 * 1024 * 1024, 4 * (blk_bytes + 2 * w_bytes)))

    kernel = functools.partial(_att_comp_kernel,
                               inv_sqrtdk=1.0 / (float(d_key) ** 0.5),
                               d_key=d_key, d_value=d_value,
                               n_topic=n_topic, lane_pad=lane_pad)

    packed = pl.pallas_call(
        kernel,
        grid=grid,
        in_specs=in_specs,
        out_specs=out_specs,
        out_shape=out_shape,
        compiler_params=pltpu.CompilerParams(
            dimension_semantics=("parallel",),
            vmem_limit_bytes=int(vmem_limit)),
        cost_estimate=cost,
    )(x_bf, *weights)

    off = 0
    att_weight = packed[..., off:off + n]; off += n
    word_repre = packed[..., off:off + d_value]; off += d_value
    topic_weight = packed[..., off:off + n_topic]; off += n_topic
    value_recon = packed[..., off:off + d_value]; off += d_value
    word_recon_no_self = packed[..., off:off + d_word]
    return att_weight, word_repre, topic_weight, value_recon, word_recon_no_self


# ---------------------------- loss glue (plain JAX) ----------------------------

def _l2_normalize(x, axis, eps=1e-12):
    nrm = jnp.sqrt(jnp.sum(x * x, axis=axis, keepdims=True))
    return x / jnp.maximum(nrm, eps)


def _diag3(m):
    return jnp.diagonal(m, axis1=1, axis2=2)


def _sinkhorn(M, a, b, lambda_sh, num_iters=200):
    # TODO(synk): sinkhorn_torch is not defined in the provided source module;
    # this is a standard fixed-iteration entropic Sinkhorn returning the per-row
    # transport cost (summed by the caller, mirroring sinkhorn_distance().sum()).
    K = jnp.exp(-M * lambda_sh)
    u0 = jnp.ones_like(a) / a.shape[0]

    def body(_, u):
        v = b / (K.T @ u + 1e-8)
        return a / (K @ v + 1e-8)

    u = jax.lax.fori_loop(0, num_iters, body, u0)
    v = b / (K.T @ u + 1e-8)
    P = u[:, None] * K * v[None, :]
    return jnp.sum(P * M, axis=1)


def model_att_comp_forward(x_idx, params, rng):
    x_emb = jnp.take(params["embeddings"], x_idx, axis=0)     # (B, n, d_word) f32
    (att_weight, word_repre, topic_weight,
     value_recon, word_recon_no_self) = att_comp_pallas(x_emb, params)

    B, n, _ = x_emb.shape
    n_topic = topic_weight.shape[-1]

    # Sentence topic distribution (cheap (n,n_topic)->(n_topic,) reduction +
    # softmax), computed here instead of as a (B,1,n_topic) kernel output.
    topic_logits = (jnp.einsum("bit,i->bt", topic_weight, params["wt2l"][:, 0])
                    + params["bt2l"][0, 0])
    topic = jax.nn.softmax(topic_logits, axis=-1)              # (B, n_topic)

    k_perm, k_mult = jax.random.split(rng)

    # loss_word_prediction_no_self
    wrns_n = _l2_normalize(word_recon_no_self, axis=2)
    x_n = _l2_normalize(x_emb, axis=2)
    word_loss = jnp.sum(jnp.mean(1.0 - jnp.sum(wrns_n * x_n, axis=2), axis=1))

    # loss_max_margin_neg_sample (torch.randperm -> jax.random.permutation)
    wr_n = _l2_normalize(word_repre, axis=2)
    vr_n = _l2_normalize(value_recon, axis=2)
    sim_matrix = jnp.einsum("bid,bjd->bij", wr_n, vr_n)
    sim_x = _diag3(sim_matrix)
    ns = jax.random.permutation(k_perm, n)
    sim_neg = _diag3(sim_matrix[:, ns, :])
    margin_loss = jnp.sum(jnp.mean(1.0 - sim_x + sim_neg, axis=1))

    # reconstruction_loss (entropy of topic distribution); clamp avoids 0*(-inf).
    recon_loss = jnp.sum(-jnp.log(jnp.maximum(topic, 1e-30)) * topic)

    # similarity_loss (torch.multinomial -> jax.random.categorical)
    flat_w = att_weight.reshape(-1, n)
    samples = jax.random.categorical(k_mult, jnp.log(flat_w + 1e-30), axis=-1)
    tw_n = _l2_normalize(topic_weight, axis=2)
    topic_sim = jnp.einsum("bit,bjt->bij", tw_n, tw_n).reshape(B * n, n)
    picked = topic_sim[jnp.arange(B * n), samples].reshape(B, n)
    sim_loss = jnp.sum(jnp.mean(1.0 - picked, axis=1))

    # sinkhorn_distance
    a = jnp.ones((B,), jnp.float32) * n_topic / B
    b = jnp.ones((n_topic,), jnp.float32)
    sinkhorn_loss = jnp.sum(_sinkhorn(-jnp.log(topic + 1e-6), a, b, 10.0))

    return {
        "loss": word_loss + margin_loss,
        "margin_loss": margin_loss,
        "word_loss": word_loss,
        "reconstruct_loss": recon_loss,
        "similarity_loss": sim_loss,
        "sinkhorn_loss": sinkhorn_loss,
    }


# ------------------------------- parameter init --------------------------------

def init_params(key, vocab, d_word, d_key, d_value, n_topic, n):
    keys = jax.random.split(key, 20)

    def lin(kw, kb, din, dout):
        w = jax.random.normal(kw, (din, dout), jnp.float32) * 0.1
        b = jax.random.normal(kb, (1, dout), jnp.float32) * 0.1
        return w, b

    emb = jax.random.normal(keys[0], (vocab, d_word), jnp.float32)
    wq, bq = lin(keys[1], keys[2], d_word, d_key)
    wk, bk = lin(keys[3], keys[4], d_word, d_key)
    wv, bv = lin(keys[5], keys[6], d_word, d_value)
    wv2t, bv2t = lin(keys[7], keys[8], d_value, n_topic)
    # T2L = Linear(n, 1): weight stored as a column (n, 1), bias scalar (1, 1)
    wt2l = jax.random.normal(keys[9], (n, 1), jnp.float32) * 0.1
    bt2l = jax.random.normal(keys[10], (1, 1), jnp.float32) * 0.1
    # L2T = Linear(1, n): weight stored as a column (n, 1), bias as (n, 1)
    wl2t = jax.random.normal(keys[11], (n, 1), jnp.float32) * 0.1
    bl2t = jax.random.normal(keys[12], (n, 1), jnp.float32) * 0.1
    wt2v, bt2v = lin(keys[13], keys[14], n_topic, d_value)
    wv2w, bv2w = lin(keys[15], keys[16], d_value, d_word)
    return dict(embeddings=emb, wq=wq, bq=bq, wk=wk, bk=bk, wv=wv, bv=bv,
                wv2t=wv2t, bv2t=bv2t, wt2l=wt2l, bt2l=bt2l, wl2t=wl2t,
                bl2t=bl2t, wt2v=wt2v, bt2v=bt2v, wv2w=wv2w, bv2w=bv2w)


if __name__ == "__main__":
    B, n, vocab = 2, 8, 50
    d_word, d_key, d_value, n_topic = 32, 16, 16, 8

    root = jax.random.PRNGKey(0)
    k_param, k_x, k_loss = jax.random.split(root, 3)

    params = init_params(k_param, vocab, d_word, d_key, d_value, n_topic, n)
    x_idx = jax.random.randint(k_x, (B, n), 0, vocab, dtype=jnp.int32)

    out = model_att_comp_forward(x_idx, params, k_loss)
    jax.block_until_ready(out)
    print("KERNEL_OK")
</pallas_src>

<mosaic_0001>
module attributes {stable_mosaic.version = 11 : i64} {
  func.func @_att_comp_kernel(%arg0: i32, %arg1: memref<2x8x32xbf16, #tpu.memory_space<vmem>>, %arg2: memref<32x48xbf16, #tpu.memory_space<vmem>>, %arg3: memref<1x48xf32, #tpu.memory_space<vmem>>, %arg4: memref<16x8xbf16, #tpu.memory_space<vmem>>, %arg5: memref<1x8xf32, #tpu.memory_space<vmem>>, %arg6: memref<8x3xf32, #tpu.memory_space<vmem>>, %arg7: memref<8x16xbf16, #tpu.memory_space<vmem>>, %arg8: memref<1x16xf32, #tpu.memory_space<vmem>>, %arg9: memref<16x32xbf16, #tpu.memory_space<vmem>>, %arg10: memref<1x32xf32, #tpu.memory_space<vmem>>, %arg11: memref<2x8x128xf32, #tpu.memory_space<vmem>>) attributes {dimension_semantics = [#tpu.dimension_semantics<parallel>], iteration_bounds = array<i64: 1>, scalar_prefetch = 0 : i64, scratch_operands = 0 : i64, tpu.core_type = #tpu.core_type<tc>, window_params = [{transform_indices = @transform_0, window_bounds = array<i64: 2, 8, 32>}, {pipeline_mode = #tpu.pipeline_mode<synchronous>, transform_indices = @transform_1, window_bounds = array<i64: 32, 48>}, {pipeline_mode = #tpu.pipeline_mode<synchronous>, transform_indices = @transform_2, window_bounds = array<i64: 1, 48>}, {pipeline_mode = #tpu.pipeline_mode<synchronous>, transform_indices = @transform_3, window_bounds = array<i64: 16, 8>}, {pipeline_mode = #tpu.pipeline_mode<synchronous>, transform_indices = @transform_4, window_bounds = array<i64: 1, 8>}, {pipeline_mode = #tpu.pipeline_mode<synchronous>, transform_indices = @transform_5, window_bounds = array<i64: 8, 3>}, {pipeline_mode = #tpu.pipeline_mode<synchronous>, transform_indices = @transform_6, window_bounds = array<i64: 8, 16>}, {pipeline_mode = #tpu.pipeline_mode<synchronous>, transform_indices = @transform_7, window_bounds = array<i64: 1, 16>}, {pipeline_mode = #tpu.pipeline_mode<synchronous>, transform_indices = @transform_8, window_bounds = array<i64: 16, 32>}, {pipeline_mode = #tpu.pipeline_mode<synchronous>, transform_indices = @transform_9, window_bounds = array<i64: 1, 32>}, {transform_indices = @transform_10, window_bounds = array<i64: 2, 8, 128>}]} {
    %c0 = arith.constant 0 : index
    %c0_0 = arith.constant 0 : index
    %c0_1 = arith.constant 0 : index
    %0 = vector.load %arg1[%c0, %c0_0, %c0_1] : memref<2x8x32xbf16, #tpu.memory_space<vmem>>, vector<2x8x32xbf16>
    %1 = vector.shape_cast %0 : vector<2x8x32xbf16> to vector<16x32xbf16>
    %c0_2 = arith.constant 0 : index
    %c0_3 = arith.constant 0 : index
    %2 = vector.load %arg2[%c0_2, %c0_3] : memref<32x48xbf16, #tpu.memory_space<vmem>>, vector<32x48xbf16>
    %cst = arith.constant dense<0.000000e+00> : vector<16x48xf32>
    %3 = tpu.matmul %1, %2, %cst {dimension_numbers = #tpu.dot_dimension_numbers<[1], [0], [0], [1], [0, 0, 1, 1], [], []>} : vector<16x32xbf16>, vector<32x48xbf16>, vector<16x48xf32> -> vector<16x48xf32>
    %c0_4 = arith.constant 0 : index
    %c0_5 = arith.constant 0 : index
    %4 = vector.load %arg3[%c0_4, %c0_5] : memref<1x48xf32, #tpu.memory_space<vmem>>, vector<1x48xf32>
    %5 = vector.broadcast %4 : vector<1x48xf32> to vector<16x48xf32>
    %6 = arith.addf %3, %5 : vector<16x48xf32>
    %7 = vector.extract_strided_slice %6 {offsets = [0, 0], sizes = [16, 16], strides = [1, 1]} : vector<16x48xf32> to vector<16x16xf32>
    %8 = vector.shape_cast %7 : vector<16x16xf32> to vector<2x8x16xf32>
    %9 = vector.extract_strided_slice %6 {offsets = [0, 16], sizes = [16, 16], strides = [1, 1]} : vector<16x48xf32> to vector<16x16xf32>
    %10 = vector.shape_cast %9 : vector<16x16xf32> to vector<2x8x16xf32>
    %11 = vector.extract_strided_slice %6 {offsets = [0, 32], sizes = [16, 16], strides = [1, 1]} : vector<16x48xf32> to vector<16x16xf32>
    %12 = vector.shape_cast %11 : vector<16x16xf32> to vector<2x8x16xf32>
    %13 = arith.truncf %8 : vector<2x8x16xf32> to vector<2x8x16xbf16>
    %14 = arith.truncf %10 : vector<2x8x16xf32> to vector<2x8x16xbf16>
    "tpu.trace_start"() <{level = 10 : i32, message = "bqd,bkd->bqk"}> : () -> ()
    %cst_6 = arith.constant dense<0.000000e+00> : vector<2x8x8xf32>
    %15 = tpu.matmul %13, %14, %cst_6 {dimension_numbers = #tpu.dot_dimension_numbers<[2], [2], [1], [1], [0, 0, 0, 1, 1, 1], [0], [0]>} : vector<2x8x16xbf16>, vector<2x8x16xbf16>, vector<2x8x8xf32> -> vector<2x8x8xf32>
    "tpu.trace_stop"() : () -> ()
    %cst_7 = arith.constant 2.500000e-01 : f32
    %16 = vector.broadcast %cst_7 : f32 to vector<2x8x8xf32>
    %17 = arith.mulf %15, %16 : vector<2x8x8xf32>
    %cst_8 = arith.constant dense<0xFF800000> : vector<2x8xf32>
    %18 = vector.multi_reduction <maximumf>, %17, %cst_8 [2] : vector<2x8x8xf32> to vector<2x8xf32>
    %19 = vector.shape_cast %18 : vector<2x8xf32> to vector<2x8x1xf32>
    %20 = vector.broadcast %19 : vector<2x8x1xf32> to vector<2x8x8xf32>
    %21 = arith.subf %17, %20 : vector<2x8x8xf32>
    %22 = math.exp %21 : vector<2x8x8xf32>
    %cst_9 = arith.constant dense<0.000000e+00> : vector<2x8xf32>
    %23 = vector.multi_reduction <add>, %22, %cst_9 [2] : vector<2x8x8xf32> to vector<2x8xf32>
    %24 = vector.shape_cast %23 : vector<2x8xf32> to vector<2x8x1xf32>
    %25 = tpu.reciprocal %24 {approx = true} : vector<2x8x1xf32> -> vector<2x8x1xf32>
    %26 = vector.broadcast %25 : vector<2x8x1xf32> to vector<2x8x8xf32>
    %27 = arith.mulf %22, %26 : vector<2x8x8xf32>
    %28 = arith.truncf %27 : vector<2x8x8xf32> to vector<2x8x8xbf16>
    %29 = arith.truncf %12 : vector<2x8x16xf32> to vector<2x8x16xbf16>
    "tpu.trace_start"() <{level = 10 : i32, message = "bqk,bkd->bqd"}> : () -> ()
    %cst_10 = arith.constant dense<0.000000e+00> : vector<2x8x16xf32>
    %30 = tpu.matmul %28, %29, %cst_10 {dimension_numbers = #tpu.dot_dimension_numbers<[2], [1], [1], [2], [0, 0, 0, 1, 1, 2], [0], [0]>} : vector<2x8x8xbf16>, vector<2x8x16xbf16>, vector<2x8x16xf32> -> vector<2x8x16xf32>
    "tpu.trace_stop"() : () -> ()
    %31 = tpu.iota {dimensions = array<i32: 1>} : vector<2x8x8xi32>
    %32 = tpu.iota {dimensions = array<i32: 2>} : vector<2x8x8xi32>
    %33 = arith.cmpi eq, %31, %32 : vector<2x8x8xi32>
    %cst_11 = arith.constant 0.000000e+00 : f32
    %34 = vector.broadcast %cst_11 : f32 to vector<2x8x8xf32>
    %35 = arith.select %33, %22, %34 : vector<2x8x8xi1>, vector<2x8x8xf32>
    %cst_12 = arith.constant dense<0.000000e+00> : vector<2x8xf32>
    %36 = vector.multi_reduction <add>, %35, %cst_12 [2] : vector<2x8x8xf32> to vector<2x8xf32>
    %37 = vector.shape_cast %36 : vector<2x8xf32> to vector<2x8x1xf32>
    %38 = vector.broadcast %24 : vector<2x8x1xf32> to vector<2x8x16xf32>
    %39 = arith.mulf %38, %30 : vector<2x8x16xf32>
    %40 = vector.broadcast %37 : vector<2x8x1xf32> to vector<2x8x16xf32>
    %41 = arith.mulf %40, %12 : vector<2x8x16xf32>
    %42 = arith.subf %39, %41 : vector<2x8x16xf32>
    %43 = arith.subf %24, %37 : vector<2x8x1xf32>
    %44 = tpu.reciprocal %43 {approx = true} : vector<2x8x1xf32> -> vector<2x8x1xf32>
    %45 = vector.broadcast %44 : vector<2x8x1xf32> to vector<2x8x16xf32>
    %46 = arith.mulf %42, %45 : vector<2x8x16xf32>
    %47 = vector.shape_cast %30 : vector<2x8x16xf32> to vector<16x16xf32>
    %48 = arith.truncf %47 : vector<16x16xf32> to vector<16x16xbf16>
    %c0_13 = arith.constant 0 : index
    %c0_14 = arith.constant 0 : index
    %49 = vector.load %arg4[%c0_13, %c0_14] : memref<16x8xbf16, #tpu.memory_space<vmem>>, vector<16x8xbf16>
    %cst_15 = arith.constant dense<0.000000e+00> : vector<16x8xf32>
    %50 = tpu.matmul %48, %49, %cst_15 {dimension_numbers = #tpu.dot_dimension_numbers<[1], [0], [0], [1], [0, 0, 1, 1], [], []>} : vector<16x16xbf16>, vector<16x8xbf16>, vector<16x8xf32> -> vector<16x8xf32>
    %c0_16 = arith.constant 0 : index
    %c0_17 = arith.constant 0 : index
    %51 = vector.load %arg5[%c0_16, %c0_17] : memref<1x8xf32, #tpu.memory_space<vmem>>, vector<1x8xf32>
    %52 = vector.broadcast %51 : vector<1x8xf32> to vector<16x8xf32>
    %53 = arith.addf %50, %52 : vector<16x8xf32>
    %cst_18 = arith.constant dense<0xFF800000> : vector<16xf32>
    %54 = vector.multi_reduction <maximumf>, %53, %cst_18 [1] : vector<16x8xf32> to vector<16xf32>
    %55 = vector.shape_cast %54 : vector<16xf32> to vector<16x1xf32>
    %56 = vector.broadcast %55 : vector<16x1xf32> to vector<16x8xf32>
    %57 = arith.subf %53, %56 : vector<16x8xf32>
    %58 = math.exp %57 : vector<16x8xf32>
    %cst_19 = arith.constant dense<0.000000e+00> : vector<16xf32>
    %59 = vector.multi_reduction <add>, %58, %cst_19 [1] : vector<16x8xf32> to vector<16xf32>
    %60 = vector.shape_cast %59 : vector<16xf32> to vector<16x1xf32>
    %61 = tpu.reciprocal %60 {approx = true} : vector<16x1xf32> -> vector<16x1xf32>
    %62 = vector.broadcast %61 : vector<16x1xf32> to vector<16x8xf32>
    %63 = arith.mulf %58, %62 : vector<16x8xf32>
    %64 = vector.shape_cast %63 : vector<16x8xf32> to vector<2x8x8xf32>
    %c0_20 = arith.constant 0 : index
    %c0_21 = arith.constant 0 : index
    %65 = vector.load %arg6[%c0_20, %c0_21] : memref<8x3xf32, #tpu.memory_space<vmem>>, vector<8x1xf32>
    %c0_22 = arith.constant 0 : index
    %c1 = arith.constant 1 : index
    %66 = vector.load %arg6[%c0_22, %c1] : memref<8x3xf32, #tpu.memory_space<vmem>>, vector<8x1xf32>
    %c0_23 = arith.constant 0 : index
    %c2 = arith.constant 2 : index
    %67 = vector.load %arg6[%c0_23, %c2] : memref<8x3xf32, #tpu.memory_space<vmem>>, vector<8x1xf32>
    %68 = vector.shape_cast %65 : vector<8x1xf32> to vector<1x8x1xf32>
    %69 = vector.broadcast %68 : vector<1x8x1xf32> to vector<2x8x8xf32>
    %70 = arith.mulf %64, %69 : vector<2x8x8xf32>
    %cst_24 = arith.constant dense<0.000000e+00> : vector<2x8xf32>
    %71 = vector.multi_reduction <add>, %70, %cst_24 [1] : vector<2x8x8xf32> to vector<2x8xf32>
    %cst_25 = arith.constant dense<0xFF800000> : vector<2xf32>
    %72 = vector.multi_reduction <maximumf>, %71, %cst_25 [1] : vector<2x8xf32> to vector<2xf32>
    %73 = vector.shape_cast %72 : vector<2xf32> to vector<2x1xf32>
    %74 = vector.broadcast %73 : vector<2x1xf32> to vector<2x8xf32>
    %75 = arith.subf %71, %74 : vector<2x8xf32>
    %76 = math.exp %75 : vector<2x8xf32>
    %cst_26 = arith.constant dense<0.000000e+00> : vector<2xf32>
    %77 = vector.multi_reduction <add>, %76, %cst_26 [1] : vector<2x8xf32> to vector<2xf32>
    %78 = vector.shape_cast %77 : vector<2xf32> to vector<2x1xf32>
    %79 = tpu.reciprocal %78 {approx = true} : vector<2x1xf32> -> vector<2x1xf32>
    %80 = vector.broadcast %79 : vector<2x1xf32> to vector<2x8xf32>
    %81 = arith.mulf %76, %80 : vector<2x8xf32>
    %82 = vector.shape_cast %66 : vector<8x1xf32> to vector<1x8x1xf32>
    %83 = vector.shape_cast %81 : vector<2x8xf32> to vector<2x1x8xf32>
    %84 = vector.broadcast %82 : vector<1x8x1xf32> to vector<2x8x8xf32>
    %85 = vector.broadcast %83 : vector<2x1x8xf32> to vector<2x8x8xf32>
    %86 = arith.mulf %84, %85 : vector<2x8x8xf32>
    %87 = vector.shape_cast %67 : vector<8x1xf32> to vector<1x8x1xf32>
    %88 = vector.broadcast %87 : vector<1x8x1xf32> to vector<2x8x8xf32>
    %89 = arith.addf %86, %88 : vector<2x8x8xf32>
    %90 = vector.shape_cast %89 : vector<2x8x8xf32> to vector<16x8xf32>
    %91 = arith.truncf %90 : vector<16x8xf32> to vector<16x8xbf16>
    %c0_27 = arith.constant 0 : index
    %c0_28 = arith.constant 0 : index
    %92 = vector.load %arg7[%c0_27, %c0_28] : memref<8x16xbf16, #tpu.memory_space<vmem>>, vector<8x16xbf16>
    %cst_29 = arith.constant dense<0.000000e+00> : vector<16x16xf32>
    %93 = tpu.matmul %91, %92, %cst_29 {dimension_numbers = #tpu.dot_dimension_numbers<[1], [0], [0], [1], [0, 0, 1, 1], [], []>} : vector<16x8xbf16>, vector<8x16xbf16>, vector<16x16xf32> -> vector<16x16xf32>
    %c0_30 = arith.constant 0 : index
    %c0_31 = arith.constant 0 : index
    %94 = vector.load %arg8[%c0_30, %c0_31] : memref<1x16xf32, #tpu.memory_space<vmem>>, vector<1x16xf32>
    %95 = vector.broadcast %94 : vector<1x16xf32> to vector<16x16xf32>
    %96 = arith.addf %93, %95 : vector<16x16xf32>
    %97 = vector.shape_cast %46 : vector<2x8x16xf32> to vector<16x16xf32>
    %98 = arith.truncf %97 : vector<16x16xf32> to vector<16x16xbf16>
    %c0_32 = arith.constant 0 : index
    %c0_33 = arith.constant 0 : index
    %99 = vector.load %arg9[%c0_32, %c0_33] : memref<16x32xbf16, #tpu.memory_space<vmem>>, vector<16x32xbf16>
    %cst_34 = arith.constant dense<0.000000e+00> : vector<16x32xf32>
    %100 = tpu.matmul %98, %99, %cst_34 {dimension_numbers = #tpu.dot_dimension_numbers<[1], [0], [0], [1], [0, 0, 1, 1], [], []>} : vector<16x16xbf16>, vector<16x32xbf16>, vector<16x32xf32> -> vector<16x32xf32>
    %c0_35 = arith.constant 0 : index
    %c0_36 = arith.constant 0 : index
    %101 = vector.load %arg10[%c0_35, %c0_36] : memref<1x32xf32, #tpu.memory_space<vmem>>, vector<1x32xf32>
    %102 = vector.broadcast %101 : vector<1x32xf32> to vector<16x32xf32>
    %103 = arith.addf %100, %102 : vector<16x32xf32>
    %104 = vector.shape_cast %27 : vector<2x8x8xf32> to vector<16x8xf32>
    %cst_37 = arith.constant 0.000000e+00 : f32
    %105 = vector.broadcast %cst_37 : f32 to vector<16x48xf32>
    %106 = tpu.concatenate %104, %47, %63, %96, %103, %105 in 1 : vector<16x8xf32>, vector<16x16xf32>, vector<16x8xf32>, vector<16x16xf32>, vector<16x32xf32>, vector<16x48xf32> -> vector<16x128xf32>
    %107 = vector.shape_cast %106 : vector<16x128xf32> to vector<2x8x128xf32>
    %c0_38 = arith.constant 0 : index
    %c0_39 = arith.constant 0 : index
    %c0_40 = arith.constant 0 : index
    %108 = vector.load %arg11[%c0_38, %c0_39, %c0_40] : memref<2x8x128xf32, #tpu.memory_space<vmem>>, vector<2x8x128xf32>
    tpu.vector_store %arg11[%c0_38, %c0_39, %c0_40], %107 {strides = array<i32>} : memref<2x8x128xf32, #tpu.memory_space<vmem>>, vector<2x8x128xf32>,
    return
  }
  func.func @transform_0(%arg0: i32) -> (i32, i32, i32) {
    %c0_i32 = arith.constant 0 : i32
    %c0_i32_0 = arith.constant 0 : i32
    %c0_i32_1 = arith.constant 0 : i32
    return %arg0, %c0_i32, %c0_i32_0 : i32, i32, i32
  }
  func.func @transform_1(%arg0: i32) -> (i32, i32) {
    %c0_i32 = arith.constant 0 : i32
    %c0_i32_0 = arith.constant 0 : i32
    %c0_i32_1 = arith.constant 0 : i32
    return %c0_i32, %c0_i32_0 : i32, i32
  }
  func.func @transform_2(%arg0: i32) -> (i32, i32) {
    %c0_i32 = arith.constant 0 : i32
    %c0_i32_0 = arith.constant 0 : i32
    %c0_i32_1 = arith.constant 0 : i32
    return %c0_i32, %c0_i32_0 : i32, i32
  }
  func.func @transform_3(%arg0: i32) -> (i32, i32) {
    %c0_i32 = arith.constant 0 : i32
    %c0_i32_0 = arith.constant 0 : i32
    %c0_i32_1 = arith.constant 0 : i32
    return %c0_i32, %c0_i32_0 : i32, i32
  }
  func.func @transform_4(%arg0: i32) -> (i32, i32) {
    %c0_i32 = arith.constant 0 : i32
    %c0_i32_0 = arith.constant 0 : i32
    %c0_i32_1 = arith.constant 0 : i32
    return %c0_i32, %c0_i32_0 : i32, i32
  }
  func.func @transform_5(%arg0: i32) -> (i32, i32) {
    %c0_i32 = arith.constant 0 : i32
    %c0_i32_0 = arith.constant 0 : i32
    %c0_i32_1 = arith.constant 0 : i32
    return %c0_i32, %c0_i32_0 : i32, i32
  }
  func.func @transform_6(%arg0: i32) -> (i32, i32) {
    %c0_i32 = arith.constant 0 : i32
    %c0_i32_0 = arith.constant 0 : i32
    %c0_i32_1 = arith.constant 0 : i32
    return %c0_i32, %c0_i32_0 : i32, i32
  }
  func.func @transform_7(%arg0: i32) -> (i32, i32) {
    %c0_i32 = arith.constant 0 : i32
    %c0_i32_0 = arith.constant 0 : i32
    %c0_i32_1 = arith.constant 0 : i32
    return %c0_i32, %c0_i32_0 : i32, i32
  }
  func.func @transform_8(%arg0: i32) -> (i32, i32) {
    %c0_i32 = arith.constant 0 : i32
    %c0_i32_0 = arith.constant 0 : i32
    %c0_i32_1 = arith.constant 0 : i32
    return %c0_i32, %c0_i32_0 : i32, i32
  }
  func.func @transform_9(%arg0: i32) -> (i32, i32) {
    %c0_i32 = arith.constant 0 : i32
    %c0_i32_0 = arith.constant 0 : i32
    %c0_i32_1 = arith.constant 0 : i32
    return %c0_i32, %c0_i32_0 : i32, i32
  }
  func.func @transform_10(%arg0: i32) -> (i32, i32, i32) {
    %c0_i32 = arith.constant 0 : i32
    %c0_i32_0 = arith.constant 0 : i32
    %c0_i32_1 = arith.constant 0 : i32
    return %arg0, %c0_i32, %c0_i32_0 : i32, i32, i32
  }
}

</mosaic_0001>

<bundles_post_ra>
// kernel: tpu_custom_call.1
= control target key start
LH: loop header
LB: loop body
LE: loop exit
PB: predicated region body
PF: predicated region fallthrough
CT: control target
= control target key end

     0   :  { %v862_v1 = vmov 0.0   ;;  %vm863_vm0 = vmmov 0   ;;  %s1094_s0 = inlined_call_operand.vmem [shape: bf16[2,8,32], index: 0, kind: input, shape index: {}]   ;;  %s1095_s1 = inlined_call_operand.vmem [shape: bf16[32,48], index: 1, kind: input, shape index: {}]   ;;  %s1096_s2 = inlined_call_operand.vmem [shape: f32[1,48], index: 2, kind: input, shape index: {}]   ;;  %s1097_s3 = inlined_call_operand.vmem [shape: bf16[16,8], index: 3, kind: input, shape index: {}]   ;;  %s1098_s4 = inlined_call_operand.vmem [shape: f32[1,8], index: 4, kind: input, shape index: {}]   ;;  %s1099_s5 = inlined_call_operand.vmem [shape: f32[8,3], index: 5, kind: input, shape index: {}]   ;;  %s1100_s6 = inlined_call_operand.vmem [shape: bf16[8,16], index: 6, kind: input, shape index: {}]   ;;  %s1101_s7 = inlined_call_operand.vmem [shape: f32[1,16], index: 7, kind: input, shape index: {}]   ;;  %s1102_s8 = inlined_call_operand.vmem [shape: bf16[16,32], index: 8, kind: input, shape index: {}]   ;;  %s1103_s9 = inlined_call_operand.vmem [shape: f32[1,32], index: 9, kind: input, shape index: {}]   ;;  %s1104_s10 = inlined_call_operand.hbm [shape: f32[2,8,128], index: 10, kind: output, shape index: {}]  }
   0x1   :  { %v807_v0 = vld [vmem:[%s1095_s1] sm:$0xff]   ;;  %741 = vmatprep.subr.bf16.mxu0 %v862_v1  ;;  %749 = vmatprep.subr.bf16.mxu1 %v862_v1  ;;  %v808_v2 = vld [vmem:[%s1095_s1 + $0x8] sm:$0xff]  }
   0x2   :  { %742 = vmatpush3.bf16.msra.mxu0 %v807_v0  ;;  %745 = vmatprep.mubr.msk.bf16.mxu0 %vm863_vm0, %v862_v1 }
   0x3   :  { %743 = vmatprep.subr.bf16.mxu0 %v862_v1  ;;  %751 = vmatprep.mubr.msk.bf16.mxu1 %vm863_vm0, %v862_v1 }
   0x4   :  { %15 = vsyncpa [#allocation3], 0  ;;  %v809_v3 = vld [vmem:[%s1094_s0] sm:$0xff]   ;;  %vm67_vm1 = vcmask 261120   ;;  %s864_s0 = smov 112   ;;  %vm117_vm2 = vcmask 130048  }
   0x5   :  { %v707_v4 = vld [vmem:[%s1096_s2] ss:$0 sm:$0xff]  ;;  %vm215_vm3 = vcmask 64512   ;;  %s865_s2 = smov 96   ;;  %vm245_vm4 = vcmask 1043456   ;;  %vm476_vm5 = vcmask 1041409  }
   0x6   :  { %744 = vmatpush3.bf16.msra.mxu0 %v808_v2  ;;  %v810_v51 = vld [vmem:[%s1097_s3] sm:$0xff]   ;;  %vm479_vm6 = vcmask 58368   ;;  %s870_s24 = smov 24   ;;  %s871_s11 = smov 32   ;;  %vm678_vm8 = vcmask 195584   ;;  %vm683_vm9 = vcmask 392192  }
   0x7   :  { %755 = vmatprep.subr.bf16.mxu0 %v862_v1  ;;  %v716_v61 = vld [vmem:[%s1098_s4] ss:$0 sm:$0xff]  ;;  %s872_s12 = smov 48   ;;  %vm686_vm10 = vcmask 654336  }
   0x9   :  { %746 = vmatmul.mubr.msk.bf16.vlgmr.msra.gmra.mrb[0].mxu0 %vm67_vm1, %v809_v3 }
   0xa   :  { %757 = vmatprep.mubr.msk.bf16.mxu0 %vm863_vm0, %v862_v1 }
  0xdc   :  { %v105_v5 = vpop.f32.mrb[0].mxu0 }
  0xdd   :  { %v953_v6 = vadd.f32 %v707_v4, %v105_v5  ;;  %v747_v7 = vpop.f32.mrb[1].mxu0 }
  0xde   :  { %v108_v8 = vpop.f32.mrb[2].mxu0 }
  0xdf   :  { %v112_v9 = vpack.c.bf16 %v953_v6, %v953_v6  ;;  %v957_v10 = vadd.f32 %v707_v4, %v108_v8  ;;  %v748_v11 = vpop.f32.mrb[3].mxu0  ;;  %v866_v8 = vmov 0  }
  0xe0   :  { %804 = vset.pattern.permute.xlu0 %v866_v8 }
  0xe1   :  { %115 = vrot.lane.b32.xlu0 %v112_v9, %s864_s0  ;;  %v113_v12 = vpack.c.bf16 %v957_v10, %v957_v10 }
  0xe5   :  { %165 = vrot.lane.b32.xlu0 %v113_v12, %s864_s0 }
 0x153   :  { %v116_v13 = vpop.permute.xlu0 %115 }
 0x154   :  { %v122_v14 = vsel %vm117_vm2, %v116_v13, 0 }
 0x155   :  { %750 = vmatpush3.bf16.xpose.msra.mxu1 %v122_v14 }
 0x156   :  { %761 = vmatprep.subr.bf16.mxu1 %v862_v1 }
 0x157   :  { %v166_v15 = vpop.permute.xlu0 %165 }
 0x158   :  { %v171_v16 = vsel %vm117_vm2, %v166_v15, 0 }
 0x159   :  { %756 = vmatpush3.bf16.xpose.msra.mxu0 %v171_v16 }
 0x15a   :  { %767 = vmatprep.subr.bf16.mxu0 %v862_v1 }
 0x15c   :  { %752 = vmatmul.mubr.msk.bf16.vlgmr.msra.gmra.mrb[0].mxu1 %vm117_vm2, %v112_v9 }
 0x15d   :  { %763 = vmatprep.mubr.msk.bf16.mxu1 %vm863_vm0, %v862_v1 }
 0x160   :  { %758 = vmatmul.mubr.msk.bf16.vlgmr.msra.gmra.mrb[4].mxu0 %vm117_vm2, %v113_v12 }
 0x161   :  { %769 = vmatprep.mubr.msk.bf16.mxu0 %vm863_vm0, %v862_v1 }
 0x22f   :  { %v158_v17 = vpop.f32.mrb[0].mxu1 }
 0x230   :  { %v213_v18 = vmul.f32 0.25, %v158_v17  ;;  %v753_v19 = vpop.f32.mrb[1].mxu1 }
 0x231   :  { %v161_v20 = vpop.f32.mrb[2].mxu1  ;;  %v452_v19 = vld [vmem:[%s1099_s5] sm:$0xff]  ;;  %s869_s5 = smov 8  }
 0x232   :  { %v754_v21 = vpop.f32.mrb[3].mxu1  ;;  %v216_v22 = vsel %vm215_vm3, %v213_v18, -inf  ;;  %v867_v20 = vmov 1  }
 0x233   :  { %217 = vmax.xlane.f32.xlu1 %v216_v22  ;;  %v207_v23 = vpop.f32.mrb[4].mxu0  ;;  %v868_v21 = vmov 2  }
 0x234   :  { %v214_v24 = vmul.f32 0.25, %v207_v23  ;;  %v759_v25 = vpop.f32.mrb[5].mxu0  ;;  %805 = vset.pattern.permute.xlu1 %v867_v20 }
 0x235   :  { %v210_v26 = vpop.f32.mrb[6].mxu0 }
 0x236   :  { %v760_v27 = vpop.f32.mrb[7].mxu0  ;;  %v219_v28 = vsel %vm215_vm3, %v214_v24, -inf }
 0x237   :  { %220 = vmax.xlane.f32.xlu1 %v219_v28 }
 0x248   :  { %240 = vrot.lane.b32.xlu1 %v112_v9, %s865_s2 }
 0x2c0   :  { %v218_v29 = vpop.xlane.xlu1 %217 }
 0x2c1   :  { %v222_v30 = vsub.f32 %v213_v18, %v218_v29 }
 0x2c3   :  { %v224_v31 = vmul.f32 1.442695, %v222_v30 }
 0x2c4   :  { %v221_v32 = vpop.xlane.xlu1 %220 }
 0x2c5   :  { %812 = vpow2.f32 %v224_v31  ;;  %v223_v33 = vsub.f32 %v214_v24, %v221_v32 }
 0x2c7   :  { %v226_v34 = vmul.f32 1.442695, %v223_v33 }
 0x2c8   :  { %v241_v35 = vpop.permute.xlu1 %240 }
 0x2c9   :  { %814 = vpow2.f32 %v226_v34  ;;  %v247_v36 = vsel %vm245_vm4, %v241_v35, 0 }
 0x2ca   :  { %762 = vmatpush3.bf16.msra.mxu1 %v247_v36 }
 0x2cb   :  { %773 = vmatprep.subr.bf16.mxu1 %v862_v1 }
 0x2cf   :  { %v976_v37 = vpop.eup %812 }
 0x2d0   :  { %v228_v38 = vsel %vm215_vm3, %v976_v37, 0.0 }
 0x2d1   :  { %229 = vadd.xlane.f32.xlu0 %v228_v38 }
 0x2d3   :  { %v980_v39 = vpop.eup %814 }
 0x2d4   :  { %v231_v40 = vsel %vm215_vm3, %v980_v39, 0.0 }
 0x2d5   :  { %232 = vadd.xlane.f32.xlu1 %v231_v40 }
 0x2e6   :  { %289 = vrot.lane.b32.xlu1 %v113_v12, %s865_s2 }
 0x35e   :  { %v985_v41 = vpop.xlane.xlu0 %229 }
 0x35f   :  { %816 = vrcp.f32 %v985_v41 }
 0x362   :  { %v988_v42 = vpop.xlane.xlu1 %232 }
 0x363   :  { %818 = vrcp.f32 %v988_v42 }
 0x366   :  { %v290_v43 = vpop.permute.xlu1 %289 }
 0x367   :  { %v295_v44 = vsel %vm245_vm4, %v290_v43, 0  ;;  %v337_v43 = vlaneseq }
 0x368   :  { %768 = vmatpush3.bf16.msra.mxu0 %v295_v44 }
 0x369   :  { %v817_v45 = vpop.eup %816  ;;  %779 = vmatprep.subr.bf16.mxu0 %v862_v1 }
 0x36a   :  { %v994_v46 = vmul.f32 %v817_v45, %v976_v37 }
 0x36c   :  { %v238_v47 = vpack.c.bf16 %v994_v46, %v994_v46 }
 0x36d   :  { %v819_v48 = vpop.eup %818 }
 0x36e   :  { %764 = vmatmul.mubr.msk.bf16.vlgmr.msra.gmra.mrb[4].mxu1 %vm215_vm3, %v238_v47  ;;  %v1000_v49 = vmul.f32 %v819_v48, %v980_v39  ;;  %v1034_v48 = vshrl.u32 %v337_v43, 7 }
 0x36f   :  { %775 = vmatprep.mubr.msk.bf16.mxu1 %vm863_vm0, %v862_v1  ;;  %774 = vmatpush3.bf16.msra.mxu1 %v810_v51 }
 0x370   :  { %v239_v50 = vpack.c.bf16 %v1000_v49, %v1000_v49  ;;  %785 = vmatprep.subr.bf16.mxu1 %v862_v1 }
 0x372   :  { %770 = vmatmul.mubr.msk.bf16.vlgmr.msra.gmra.mrb[8].mxu0 %vm215_vm3, %v239_v50  ;;  %v340_v50 = vand.u32 127, %v337_v43 }
 0x373   :  { %781 = vmatprep.mubr.msk.bf16.mxu0 %vm863_vm0, %v862_v1 }
 0x374   :  { %vm341_vm7 = vcmp.eq.s32.totalorder %v1034_v48, %v340_v50 }
 0x441   :  { %v1013_v52 = vpop.f32.mrb[4].mxu1 }
 0x442   :  { %v765_v53 = vpop.f32.mrb[5].mxu1 }
 0x443   :  { %v286_v54 = vpop.f32.mrb[6].mxu1 }
 0x444   :  { %v766_v55 = vpop.f32.mrb[7].mxu1 }
 0x445   :  { %v1015_v56 = vpop.f32.mrb[8].mxu0 }
 0x446   :  { %v370_v57 = vpack.c.bf16 %v1015_v56, %v1013_v52  ;;  %v771_v58 = vpop.f32.mrb[9].mxu0 }
 0x447   :  { %v334_v59 = vpop.f32.mrb[10].mxu0  ;;  %v342_v58 = vsel %vm341_vm7, %v976_v37, 0.0 }
 0x448   :  { %v772_v60 = vpop.f32.mrb[11].mxu0  ;;  %776 = vmatmul.mubr.msk.bf16.vlgmr.msra.gmra.mrb[8].mxu1 %vm117_vm2, %v370_v57  ;;  %v344_v59 = vsel %vm215_vm3, %v342_v58, 0.0 }
 0x449   :  { %787 = vmatprep.mubr.msk.bf16.mxu1 %vm863_vm0, %v862_v1  ;;  %v343_v60 = vsel %vm341_vm7, %v980_v39, 0.0 }
 0x51b   :  { %v423_v62 = vpop.f32.mrb[8].mxu1 }
 0x51c   :  { %v424_v63 = vadd.f32 %v716_v61, %v423_v62  ;;  %v777_v0 = vpop.f32.mrb[9].mxu1 }
 0x51d   :  { %v426_v2 = vpop.f32.mrb[10].mxu1 }
 0x51e   :  { %v427_v3 = vadd.f32 %v716_v61, %v426_v2  ;;  %v778_v4 = vpop.f32.mrb[11].mxu1  ;;  %v430_v5 = vsel %vm215_vm3, %v424_v63, -inf  ;;  %v347_v61 = vsel %vm215_vm3, %v343_v60, 0.0 }
 0x51f   :  { %431 = vmax.xlane.f32.xlu1 %v430_v5 }
 0x520   :  { %v433_v7 = vsel %vm215_vm3, %v427_v3, -inf }
 0x521   :  { %434 = vmax.xlane.f32.xlu0 %v433_v7 }
 0x5ac   :  { %v432_v9 = vpop.xlane.xlu1 %431 }
 0x5ad   :  { %v436_v1 = vsub.f32 %v424_v63, %v432_v9 }
 0x5ae   :  { %v435_v11 = vpop.xlane.xlu0 %434 }
 0x5af   :  { %v438_v12 = vmul.f32 1.442695, %v436_v1  ;;  %v437_v13 = vsub.f32 %v427_v3, %v435_v11 }
 0x5b1   :  { %820 = vpow2.f32 %v438_v12  ;;  %v440_v14 = vmul.f32 1.442695, %v437_v13  ;;  %v529_v13 = vld [vmem:[%s1100_s6] sm:$0xf] }
 0x5b3   :  { %822 = vpow2.f32 %v440_v14  ;;  %v541_v14 = vsel %vm245_vm4, %v529_v13, 0 }
 0x5b4   :  { %780 = vmatpush3.bf16.msra.mxu0 %v541_v14 }
 0x5bb   :  { %v821_v15 = vpop.eup %820 }
 0x5bc   :  { %v442_v16 = vsel %vm215_vm3, %v821_v15, 0.0 }
 0x5bd   :  { %v823_v17 = vpop.eup %822  ;;  %443 = vadd.xlane.f32.xlu0 %v442_v16  ;;  %v351_v16 = vmul.f32 %v1015_v56, %v988_v42 }
 0x5be   :  { %v445_v18 = vsel %vm215_vm3, %v823_v17, 0.0 }
 0x5c1   :  { %446 = vadd.xlane.f32.xlu0 %v445_v18 }
 0x5d7   :  { %455 = vperm.xlu0 %804, %v452_v19  }
 0x5db   :  { %806 = vset.pattern.permute.xlu0 %v868_v21 }
 0x5dc   :  { %523 = vperm.xlu0 %806, %v452_v19  }
 0x64a   :  { %v444_v22 = vpop.xlane.xlu0 %443 }
 0x64b   :  { %824 = vrcp.f32 %v444_v22 }
 0x64e   :  { %v447_v23 = vpop.xlane.xlu0 %446 }
 0x64f   :  { %826 = vrcp.f32 %v447_v23 }
 0x655   :  { %v825_v24 = vpop.eup %824 }
 0x656   :  { %v450_v25 = vmul.f32 %v825_v24, %v821_v15  ;;  %v456_v26 = vpop.permute.xlu0 %455  ;;  %v350_v24 = vmul.f32 %v1013_v52, %v985_v41 }
 0x658   :  { %v458_v27 = vmul.f32 %v456_v26, %v450_v25 }
 0x659   :  { %v827_v28 = vpop.eup %826 }
 0x65a   :  { %v451_v29 = vmul.f32 %v827_v28, %v823_v17  ;;  %v460_v30 = vsel %vm215_vm3, %v458_v27, 0.0 }
 0x65b   :  { %v461_v31 = vrot.slane %v460_v30, 4  ;;  %v524_v15 = vpop.permute.xlu0 %523 }
 0x65c   :  { %v459_v32 = vmul.f32 %v456_v26, %v451_v29 }
 0x65d   :  { %v462_v33 = vadd.f32 %v461_v31, %v460_v30 }
 0x65e   :  { %v467_v34 = vsel %vm215_vm3, %v459_v32, 0.0 }
 0x65f   :  { %v463_v35 = vrot.slane %v462_v33, 2  ;;  %v468_v36 = vrot.slane %v467_v34, 4 }
 0x661   :  { %v464_v38 = vadd.f32 %v463_v35, %v462_v33  ;;  %v469_v40 = vadd.f32 %v468_v36, %v467_v34 }
 0x663   :  { %v470_v44 = vrot.slane %v469_v40, 2  ;;  %v465_v47 = vrot.slane %v464_v38, 1 }
 0x665   :  { %v471_v45 = vadd.f32 %v470_v44, %v469_v40  ;;  %v466_v53 = vadd.f32 %v465_v47, %v464_v38  ;;  %v719_v47 = vld [vmem:[%s1101_s7] ss:$0 sm:$0xff]  ;;  %s873_s7 = smov [#allocation2]  }
 0x667   :  { %v472_v51 = vrot.slane %v471_v45, 1 }
 0x669   :  { %v473_v54 = vadd.f32 %v472_v51, %v471_v45 }
 0x66b   :  { %v477_v55 = vsel %vm476_vm5, %v473_v54, %v466_v53 }
 0x66c   :  { %v480_v57 = vsel %vm479_vm6, %v477_v55, -inf }
 0x66d   :  { %481 = vmax.xlane.f32.xlu1 %v480_v57 }
 0x671   :  { %345 = vadd.xlane.f32.xlu1 %v344_v59 }
 0x675   :  { %348 = vadd.xlane.f32.xlu1 %v347_v61 }
 0x686   :  { %509 = vperm.xlu1 %805, %v452_v19  }
 0x6fa   :  { %v482_v62 = vpop.xlane.xlu1 %481 }
 0x6fb   :  { %v484_v63 = vrot.slane %v482_v62, 1  ;;  %v487_v0 = vsub.f32 %v466_v53, %v482_v62  ;;  %v721_v53 = vld [vmem:[%s1103_s9] ss:$0 sm:$0xff]  ;;  %s696_s9 = sshll.u32 %s873_s7, 4  ;;  %s697_s9 = int_to_ptr.vmem [resolvable:$true] %s696_s9 }
 0x6fc   :  { %s838_s13 = scalar_lea.vmem %s697_s9, 256  ;;  %p843_p1 = scmp.lt.s32.totalorder %s697_s9, %s697_s9 }
 0x6fd   :  { %v488_v2 = vsub.f32 %v473_v54, %v484_v63  ;;  %v489_v4 = vmul.f32 1.442695, %v487_v0  ;;  %p839_p0 = scmp.ne.s32.totalorder %s697_s9, %s838_s13  ;;  %p844_p2 = scmp.lt.s32.totalorder %s838_s13, %s838_s13 }
 0x6fe   :  { %v346_v3 = vpop.xlane.xlu1 %345 }
 0x6ff   :  { %v491_v5 = vmul.f32 1.442695, %v488_v2  ;;  %v352_v12 = vmul.f32 %v346_v3, %v953_v6  ;;  %v364_v21 = vsub.f32 %v985_v41, %v346_v3  ;;  %p845_p3 = por %p844_p2, %p843_p1 }
 0x701   :  { %828 = vpow2.f32 %v491_v5  ;;  %p846_p4 = pnand %p845_p3, %p839_p0 }
 0x702   :  { %v349_v7 = vpop.xlane.xlu1 %348  ;;  %830 = vpow2.f32 %v489_v4 }
 0x703   :  { %v353_v37 = vmul.f32 %v349_v7, %v957_v10  ;;  %v811_v10 = vld [vmem:[%s1102_s8] sm:$0xff]   ;;  %v365_v6 = vsub.f32 %v988_v42, %v349_v7  ;;  %v514_v42 = vsub.s32 0, %v1034_v48 }
 0x704   :  { %786 = vmatpush3.bf16.msra.mxu1 %v811_v10 }
 0x705   :  { %358 = vrot.lane.b32.xlu0 %v353_v37, %s865_s2  ;;  %832 = vrcp.f32 %v365_v6 }
 0x706   :  { %834 = vrcp.f32 %v364_v21  ;;  %v510_v22 = vpop.permute.xlu1 %509 }
 0x709   :  { %648 = vrot.lane.b32.xlu0 %v1015_v56, %s869_s5 }
 0x70b   :  { %v829_v39 = vpop.eup %828 }
 0x70c   :  { %v495_v8 = vrot.slane %v829_v39, 7  ;;  %v831_v9 = vpop.eup %830 }
 0x70d   :  { %656 = vrot.lane.b32.xlu0 %v451_v29, %s870_s24 }
 0x70e   :  { %v496_v1 = vsel %vm476_vm5, %v495_v8, %v831_v9 }
 0x70f   :  { %v498_v11 = vsel %vm479_vm6, %v496_v1, 0.0  ;;  %v833_v19 = vpop.eup %832 }
 0x710   :  { %499 = vadd.xlane.f32.xlu1 %v498_v11  ;;  %v835_v27 = vpop.eup %834 }
 0x721   :  { %356 = vrot.lane.b32.xlu1 %v352_v12, %s865_s2 }
 0x725   :  { %646 = vrot.lane.b32.xlu1 %v1013_v52, %s869_s5 }
 0x729   :  { %654 = vrot.lane.b32.xlu1 %v450_v25, %s870_s24 }
 0x777   :  { %v359_v17 = vpop.permute.xlu0 %358 }
 0x778   :  { %v363_v18 = vsub.f32 %v351_v16, %v359_v17 }
 0x77a   :  { %v369_v20 = vmul.f32 %v833_v19, %v363_v18 }
 0x77b   :  { %v649_v61 = vpop.permute.xlu0 %648 }
 0x77c   :  { %v677_v5 = vsel %vm215_vm3, %v1000_v49, %v649_v61 }
 0x77f   :  { %v657_v63 = vpop.permute.xlu0 %656 }
 0x79d   :  { %v500_v23 = vpop.xlane.xlu1 %499 }
 0x79e   :  { %836 = vrcp.f32 %v500_v23 }
 0x7a1   :  { %v357_v25 = vpop.permute.xlu1 %356 }
 0x7a2   :  { %v362_v26 = vsub.f32 %v350_v24, %v357_v25 }
 0x7a4   :  { %v368_v28 = vmul.f32 %v835_v27, %v362_v26 }
 0x7a5   :  { %v647_v60 = vpop.permute.xlu1 %646 }
 0x7a6   :  { %v584_v29 = vpack.c.bf16 %v369_v20, %v368_v28  ;;  %v676_v2 = vsel %vm215_vm3, %v994_v46, %v647_v60 }
 0x7a8   :  { %v837_v56 = vpop.eup %836  ;;  %788 = vmatmul.mubr.msk.bf16.vlgmr.msra.gmra.mrb[12].mxu1 %vm117_vm2, %v584_v29 }
 0x7a9   :  { %v503_v30 = vrot.slane %v837_v56, 1  ;;  %v506_v31 = vmul.f32 %v837_v56, %v831_v9  ;;  %v655_v62 = vpop.permute.xlu1 %654 }
 0x7aa   :  { %v679_v4 = vsel %vm678_vm8, %v676_v2, %v655_v62 }
 0x7ab   :  { %v507_v32 = vmul.f32 %v829_v39, %v503_v30  ;;  %v515_v33 = vrot.slane %v506_v31, %v514_v42  ;;  %v680_v39 = vsel %vm678_vm8, %v677_v5, %v657_v63 }
 0x7ad   :  { %v519_v34 = vrot.slane %v507_v32, %v514_v42  ;;  %v520_v35 = vmul.f32 %v515_v33, %v510_v22 }
 0x7af   :  { %v521_v36 = vmul.f32 %v519_v34, %v510_v22  ;;  %v526_v38 = vadd.f32 %v524_v15, %v520_v35 }
 0x7b1   :  { %v527_v40 = vadd.f32 %v524_v15, %v521_v36 }
 0x7b3   :  { %v528_v41 = vpack.c.bf16 %v527_v40, %v526_v38 }
 0x7b5   :  { %782 = vmatmul.mubr.msk.bf16.vlgmr.msra.gmra.mrb[12].mxu0 %vm215_vm3, %v528_v41 }
 0x87b   :  { %v637_v52 = vpop.f32.mrb[12].mxu1 }
 0x87c   :  { %v789_v43 = vpop.f32.mrb[13].mxu1  ;;  %v638_v58 = vadd.f32 %v721_v53, %v637_v52 }
 0x87d   :  { %v640_v44 = vpop.f32.mrb[14].mxu1 }
 0x87e   :  { %v790_v45 = vpop.f32.mrb[15].mxu1  ;;  %v641_v59 = vadd.f32 %v721_v53, %v640_v44 }
 0x888   :  { %v577_v48 = vpop.f32.mrb[12].mxu0 }
 0x889   :  { %v578_v50 = vadd.f32 %v719_v47, %v577_v48  ;;  %v783_v51 = vpop.f32.mrb[13].mxu0 }
 0x88a   :  { %v580_v54 = vpop.f32.mrb[14].mxu0 }
 0x88b   :  { %v581_v55 = vadd.f32 %v719_v47, %v580_v54  ;;  %662 = vrot.lane.b32.xlu1 %v578_v50, %s871_s11  ;;  %v784_v57 = vpop.f32.mrb[15].mxu0 }
 0x88d   :  { %664 = vrot.lane.b32.xlu0 %v581_v55, %s871_s11 }
 0x88f   :  { %670 = vrot.lane.b32.xlu1 %v638_v58, %s872_s12 }
 0x891   :  { %672 = vrot.lane.b32.xlu0 %v641_v59, %s872_s12 }
 0x8fd   :  { %v663_v0 = vpop.permute.xlu1 %662 }
 0x8fe   :  { %v681_v7 = vsel %vm67_vm1, %v679_v4, %v663_v0 }
 0x8ff   :  { %v665_v3 = vpop.permute.xlu0 %664 }
 0x900   :  { %v682_v9 = vsel %vm67_vm1, %v680_v39, %v665_v3 }
 0x901   :  { %v671_v37 = vpop.permute.xlu1 %670 }
 0x902   :  { %v684_v8 = vsel %vm683_vm9, %v681_v7, %v671_v37 }
 0x903   :  { %v687_v1 = vsel %vm686_vm10, %v684_v8, 0.0  ;;  %v673_v11 = vpop.permute.xlu0 %672 }
 0x904   :  { %689 = vst [vmem:[#allocation2] sm:$0xff] %v687_v1  ;;  %v685_v46 = vsel %vm683_vm9, %v682_v9, %v673_v11 }
 0x905   :  { %v688_v12 = vsel %vm686_vm10, %v685_v46, 0.0 }
 0x906   :  { %690 = vst [vmem:[#allocation2 + $0x8] sm:$0xff] %v688_v12 }
 0x907   :  { %849 = shalt.err (!%p846_p4)
}
 0x908   :  { %s850_s16 = scalar_lea.hbm %s1104_s10, 256 }
 0x909   :  { %p851_p5 = scmp.ne.s32.totalorder %s1104_s10, %s850_s16  ;;  %p854_p6 = scmp.lt.u32.totalorder %s850_s16, %s1104_s10 }
 0x90b   :  { %p856_p7 = pnand %p854_p6, %p851_p5 }
 0x90d   :  { %859 = shalt.err (!%p856_p7)
}
 0x90e   :  { %s874_s0 = smov 128  }
 0x90f   :  { %702 = dma.vmem_to_hbm [thread:$0]  %s697_s9, 256, %s1104_s10, [#allocation3], %s874_s0, %s874_s0, %s869_s5  }
 0x910   :  { %860 = dma.done.wait [#allocation3], 256  }
 0x911   :  { %861 = vsyncadd [#allocation3], 4294967040 }
 0x912   :  { %706 = vsyncpa [#allocation3], 1 }

</bundles_post_ra>
